<compile_context>
chip_gen: v7x
topology: tpu7x:2x2x1
jax: 0.10.0
libtpu: 0.0.40
codegen_flags: <defaults>
</compile_context>

<pallas_src>
import functools

import jax
import jax.numpy as jnp
from jax import lax
from jax.experimental import pallas as pl
from jax.experimental.pallas import tpu as pltpu


def _ce_loss_kernel(pred_ref, tgt_ref, out_ref, m_sc, l_sc, p_sc, *,
                    n_total, c_total, tile_n, tile_c, mask_rows, mask_cols):
    """One (row-tile, class-tile) grid step of cross-entropy.

    pred_ref: (tile_n, tile_c) predictions (native dtype)
    tgt_ref : (tile_n, 1) int32 targets
    out_ref : (1, 1, 128) f32 lane-dense partial sum for this row tile
    m_sc    : (tile_n, 1)   f32 running max
    l_sc    : (tile_n, 128) f32 running sumexp (lane-replicated)
    p_sc    : (tile_n, 128) f32 picked target logit (lane-replicated)
    """
    i = pl.program_id(0)          # row tile (parallel)
    j = pl.program_id(1)          # class tile (reduction axis, last in grid)

    @pl.when(j == 0)
    def _init():
        m_sc[...] = jnp.full((tile_n, 1), -jnp.inf, dtype=jnp.float32)
        l_sc[...] = jnp.zeros((tile_n, 128), dtype=jnp.float32)
        p_sc[...] = jnp.zeros((tile_n, 128), dtype=jnp.float32)

    # Upcast per tile (keep HBM traffic in the native dtype, e.g. bf16).
    x = pred_ref[...].astype(jnp.float32)                  # (tile_n, tile_c)
    tgt = tgt_ref[...]                                     # (tile_n, 1) int32

    # j-independent (1, tile_c) lane iota; compared against per-row *local*
    # indices so no full (tile_n, tile_c) iota or offset add is needed.
    col = lax.broadcasted_iota(jnp.int32, (1, tile_c), 1)  # (1, tile_c)
    col_off = j * tile_c

    if mask_cols:
        # Ragged C: (1, tile_c) validity row folded in with one select.
        x = jnp.where(col < (c_total - col_off), x, -jnp.inf)

    # --- online logsumexp over class tiles ---
    m_prev = m_sc[...]                                     # (tile_n, 1)
    m_new = jnp.maximum(m_prev, jnp.max(x, axis=1, keepdims=True))
    e = jnp.exp(x - m_new)                                 # (tile_n, tile_c)

    # Lane reductions on the otherwise-idle MXU: every column of `ones` is 1,
    # so every one of the 128 output lanes carries the row sum.
    ones = jnp.ones((tile_c, 128), dtype=jnp.float32)
    sum_e = jnp.dot(e, ones,
                    preferred_element_type=jnp.float32,
                    precision=lax.Precision.HIGHEST)       # (tile_n, 128)

    alpha = jnp.exp(m_prev - m_new)                        # (tile_n, 1)
    l_sc[...] = alpha * l_sc[...] + sum_e
    m_sc[...] = m_new

    # --- target logit pick (restricted to this class tile), also via MXU ---
    sel = col == (tgt - col_off)                           # (tile_n, tile_c)
    picked = jnp.dot(jnp.where(sel, x, 0.0), ones,
                     preferred_element_type=jnp.float32,
                     precision=lax.Precision.HIGHEST)      # (tile_n, 128)
    p_sc[...] = p_sc[...] + picked

    @pl.when(j == pl.num_programs(1) - 1)
    def _finalize():
        lse = jnp.log(l_sc[:, 0:1]) + m_sc[...]            # (tile_n, 1)
        per_row = lse - p_sc[:, 0:1]                       # = -logp[target]
        if mask_rows:
            row = i * tile_n + lax.broadcasted_iota(jnp.int32, (tile_n, 1), 0)
            per_row = jnp.where(row < n_total, per_row, 0.0)
        partial = jnp.sum(per_row)                         # scalar
        # Lane-dense (unmasked) store of the per-row-tile partial sum.
        out_ref[...] = jnp.broadcast_to(partial, (1, 1, 128)).astype(jnp.float32)


def _choose_tiles(n, c, itemsize):
    # Class tile: keep full C when small, else stream 128-lane-aligned chunks.
    tile_c = c if c <= 2048 else 2048
    # Row tile: ~8 MiB per prediction block (double-buffered by BlockSpec);
    # multiple of 8, capped at 1024 rows.
    target_bytes = 8 * 1024 * 1024
    tile_n = target_bytes // max(1, tile_c * itemsize)
    tile_n = max(8, min(1024, (tile_n // 8) * 8))
    if tile_n >= n:
        if n >= 16:
            # Keep >= 2 row tiles so the "parallel" axis can use both v7x cores.
            half = (n + 1) // 2
            tile_n = max(8, ((half + 7) // 8) * 8)
        else:
            tile_n = n                  # single row tile (block == full dim)
    return int(tile_n), int(tile_c)


def cross_entropy_loss(predictions, targets, *, tile_n=None, tile_c=None):
    """predictions: (N, C) float; targets: (N,) int -> scalar f32 mean CE loss."""
    n, c = predictions.shape
    # Note: a lane-dense (num_row_tiles, tile_n) target layout would save
    # ~1 MiB of VMEM but needs an in-kernel lane->sublane transpose; the
    # (tile_n, 1) column layout is kept for robustness (marginal cost).
    tgt2d = targets.astype(jnp.int32).reshape(n, 1)

    itemsize = jnp.dtype(predictions.dtype).itemsize
    auto_tn, auto_tc = _choose_tiles(n, c, itemsize)
    tile_n = auto_tn if tile_n is None else int(tile_n)
    tile_c = auto_tc if tile_c is None else int(tile_c)

    num_row_tiles = pl.cdiv(n, tile_n)
    num_col_tiles = pl.cdiv(c, tile_c)

    kernel = functools.partial(
        _ce_loss_kernel,
        n_total=n, c_total=c, tile_n=tile_n, tile_c=tile_c,
        mask_rows=(n % tile_n != 0), mask_cols=(c % tile_c != 0))

    partials = pl.pallas_call(
        kernel,
        out_shape=jax.ShapeDtypeStruct((num_row_tiles, 1, 128), jnp.float32),
        grid_spec=pltpu.PrefetchScalarGridSpec(
            num_scalar_prefetch=0,
            grid=(num_row_tiles, num_col_tiles),
            in_specs=[
                pl.BlockSpec((tile_n, tile_c), lambda i, j: (i, j)),
                pl.BlockSpec((tile_n, 1), lambda i, j: (i, 0)),
            ],
            out_specs=pl.BlockSpec((1, 1, 128), lambda i, j: (i, 0, 0)),
            scratch_shapes=[
                pltpu.VMEM((tile_n, 1), jnp.float32),     # running max m
                pltpu.VMEM((tile_n, 128), jnp.float32),   # running sumexp l
                pltpu.VMEM((tile_n, 128), jnp.float32),   # picked target logit
            ],
        ),
        compiler_params=pltpu.CompilerParams(
            dimension_semantics=("parallel", "arbitrary"),
            vmem_limit_bytes=48 * 1024 * 1024,
        ),
        cost_estimate=pl.CostEstimate(
            flops=int(5 * n * c + 4 * n * c * 128),   # VPU + 2 MXU lane-sums
            transcendentals=int(n * c),
            bytes_accessed=int(n * c * itemsize + n * 4
                               + num_row_tiles * 128 * 4),
        ),
    )(predictions, tgt2d)

    # Tiny cross-tile reduction + mean scaling (constant 1/N multiply) in JAX.
    return jnp.sum(partials[:, 0, 0]) * jnp.float32(1.0 / n)


if __name__ == "__main__":
    key = jax.random.PRNGKey(0)
    k1, k2, k3, k4, k5, k6 = jax.random.split(key, 6)

    def ref_loss(preds, tgts):
        logp = jax.nn.log_softmax(preds.astype(jnp.float32), axis=1)
        return -jnp.mean(logp[jnp.arange(preds.shape[0]), tgts])

    # Test 1: small single-tile case, auto tiling.
    N, C = 8, 128
    preds = jax.random.normal(k1, (N, C), dtype=jnp.float32)
    tgts = jax.random.randint(k2, (N,), 0, C, dtype=jnp.int32)
    loss = cross_entropy_loss(preds, tgts)
    jax.block_until_ready(loss)
    ref = ref_loss(preds, tgts)
    assert jnp.allclose(loss, ref, atol=1e-3, rtol=1e-3), (loss, ref)

    # Test 2: forced row/class tiling with ragged edges (exercises OOB row/col
    # masking, the local-target compare and the online logsumexp across tiles).
    N2, C2 = 20, 160
    preds2 = jax.random.normal(k3, (N2, C2), dtype=jnp.float32)
    tgts2 = jax.random.randint(k4, (N2,), 0, C2, dtype=jnp.int32)
    loss2 = cross_entropy_loss(preds2, tgts2, tile_n=8, tile_c=128)
    jax.block_until_ready(loss2)
    ref2 = ref_loss(preds2, tgts2)
    assert jnp.allclose(loss2, ref2, atol=1e-3, rtol=1e-3), (loss2, ref2)

    # Test 3: auto tiling with >= 2 row tiles (megacore split) + bf16 input.
    N3, C3 = 32, 384
    preds3 = jax.random.normal(k5, (N3, C3), dtype=jnp.float32).astype(jnp.bfloat16)
    tgts3 = jax.random.randint(k6, (N3,), 0, C3, dtype=jnp.int32)
    loss3 = cross_entropy_loss(preds3, tgts3)
    jax.block_until_ready(loss3)
    ref3 = ref_loss(preds3, tgts3)
    assert jnp.allclose(loss3, ref3, atol=1e-3, rtol=1e-3), (loss3, ref3)

    print("KERNEL_OK")
</pallas_src>

<mosaic_0001>
module attributes {stable_mosaic.version = 11 : i64} {
  func.func @_ce_loss_kernel(%arg0: i32, %arg1: i32, %arg2: memref<8x128xf32, #tpu.memory_space<vmem>>, %arg3: memref<8x1xi32, #tpu.memory_space<vmem>>, %arg4: memref<1x1x128xf32, #tpu.memory_space<vmem>>, %arg5: memref<8x1xf32, #tpu.memory_space<vmem>>, %arg6: memref<8x128xf32, #tpu.memory_space<vmem>>, %arg7: memref<8x128xf32, #tpu.memory_space<vmem>>) attributes {dimension_semantics = [#tpu.dimension_semantics<parallel>, #tpu.dimension_semantics<arbitrary>], iteration_bounds = array<i64: 1, 1>, scalar_prefetch = 0 : i64, scratch_operands = 3 : i64, tpu.core_type = #tpu.core_type<tc>, window_params = [{transform_indices = @transform_0, window_bounds = array<i64: 8, 128>}, {transform_indices = @transform_1, window_bounds = array<i64: 8, 1>}, {transform_indices = @transform_2, window_bounds = array<i64: 1, 1, 128>}]} {
    %c0_i32 = arith.constant 0 : i32
    %0 = arith.cmpi eq, %arg1, %c0_i32 : i32
    %1 = arith.extui %0 : i1 to i32
    %c0_i32_0 = arith.constant 0 : i32
    %2 = arith.cmpi ne, %1, %c0_i32_0 : i32
    scf.if %2 {
      %cst_22 = arith.constant 0xFF800000 : f32
      %38 = vector.broadcast %cst_22 : f32 to vector<8x1xf32>
      %c0_23 = arith.constant 0 : index
      %c0_24 = arith.constant 0 : index
      %39 = vector.load %arg5[%c0_23, %c0_24] : memref<8x1xf32, #tpu.memory_space<vmem>>, vector<8x1xf32>
      tpu.vector_store %arg5[%c0_23, %c0_24], %38 {strides = array<i32>} : memref<8x1xf32, #tpu.memory_space<vmem>>, vector<8x1xf32>,
      %cst_25 = arith.constant 0.000000e+00 : f32
      %40 = vector.broadcast %cst_25 : f32 to vector<8x128xf32>
      %c0_26 = arith.constant 0 : index
      %c0_27 = arith.constant 0 : index
      %41 = vector.load %arg6[%c0_26, %c0_27] : memref<8x128xf32, #tpu.memory_space<vmem>>, vector<8x128xf32>
      tpu.vector_store %arg6[%c0_26, %c0_27], %40 {strides = array<i32>} : memref<8x128xf32, #tpu.memory_space<vmem>>, vector<8x128xf32>,
      %cst_28 = arith.constant 0.000000e+00 : f32
      %42 = vector.broadcast %cst_28 : f32 to vector<8x128xf32>
      %c0_29 = arith.constant 0 : index
      %c0_30 = arith.constant 0 : index
      %43 = vector.load %arg7[%c0_29, %c0_30] : memref<8x128xf32, #tpu.memory_space<vmem>>, vector<8x128xf32>
      tpu.vector_store %arg7[%c0_29, %c0_30], %42 {strides = array<i32>} : memref<8x128xf32, #tpu.memory_space<vmem>>, vector<8x128xf32>,
    } else {
    }
    %c0 = arith.constant 0 : index
    %c0_1 = arith.constant 0 : index
    %3 = vector.load %arg2[%c0, %c0_1] : memref<8x128xf32, #tpu.memory_space<vmem>>, vector<8x128xf32>
    %c0_2 = arith.constant 0 : index
    %c0_3 = arith.constant 0 : index
    %4 = vector.load %arg3[%c0_2, %c0_3] : memref<8x1xi32, #tpu.memory_space<vmem>>, vector<8x1xi32>
    %5 = tpu.iota {dimensions = array<i32: 1>} : vector<1x128xi32>
    %c128_i32 = arith.constant 128 : i32
    %6 = arith.muli %arg1, %c128_i32 : i32
    %c0_4 = arith.constant 0 : index
    %c0_5 = arith.constant 0 : index
    %7 = vector.load %arg5[%c0_4, %c0_5] : memref<8x1xf32, #tpu.memory_space<vmem>>, vector<8x1xf32>
    %cst = arith.constant dense<0xFF800000> : vector<8xf32>
    %8 = vector.multi_reduction <maximumf>, %3, %cst [1] : vector<8x128xf32> to vector<8xf32>
    %9 = vector.shape_cast %8 : vector<8xf32> to vector<8x1xf32>
    %10 = arith.maximumf %7, %9 : vector<8x1xf32>
    %11 = vector.broadcast %10 : vector<8x1xf32> to vector<8x128xf32>
    %12 = arith.subf %3, %11 : vector<8x128xf32>
    %13 = math.exp %12 : vector<8x128xf32>
    %cst_6 = arith.constant 1.000000e+00 : f32
    %14 = vector.broadcast %cst_6 : f32 to vector<128x128xf32>
    %cst_7 = arith.constant dense<0.000000e+00> : vector<8x128xf32>
    %15 = tpu.matmul %13, %14, %cst_7 {dimension_numbers = #tpu.dot_dimension_numbers<[1], [0], [0], [1], [0, 0, 1, 1], [], []>, precision = #tpu.contract_precision<fp32>} : vector<8x128xf32>, vector<128x128xf32>, vector<8x128xf32> -> vector<8x128xf32>
    %16 = arith.subf %7, %10 : vector<8x1xf32>
    %17 = math.exp %16 : vector<8x1xf32>
    %c0_8 = arith.constant 0 : index
    %c0_9 = arith.constant 0 : index
    %18 = vector.load %arg6[%c0_8, %c0_9] : memref<8x128xf32, #tpu.memory_space<vmem>>, vector<8x128xf32>
    %19 = vector.broadcast %17 : vector<8x1xf32> to vector<8x128xf32>
    %20 = arith.mulf %19, %18 : vector<8x128xf32>
    %21 = arith.addf %20, %15 : vector<8x128xf32>
    %c0_10 = arith.constant 0 : index
    %c0_11 = arith.constant 0 : index
    %22 = vector.load %arg6[%c0_10, %c0_11] : memref<8x128xf32, #tpu.memory_space<vmem>>, vector<8x128xf32>
    tpu.vector_store %arg6[%c0_10, %c0_11], %21 {strides = array<i32>} : memref<8x128xf32, #tpu.memory_space<vmem>>, vector<8x128xf32>,
    %c0_12 = arith.constant 0 : index
    %c0_13 = arith.constant 0 : index
    %23 = vector.load %arg5[%c0_12, %c0_13] : memref<8x1xf32, #tpu.memory_space<vmem>>, vector<8x1xf32>
    tpu.vector_store %arg5[%c0_12, %c0_13], %10 {strides = array<i32>} : memref<8x1xf32, #tpu.memory_space<vmem>>, vector<8x1xf32>,
    %24 = vector.broadcast %6 : i32 to vector<8x1xi32>
    %25 = arith.subi %4, %24 : vector<8x1xi32>
    %26 = vector.broadcast %5 : vector<1x128xi32> to vector<8x128xi32>
    %27 = vector.broadcast %25 : vector<8x1xi32> to vector<8x128xi32>
    %28 = arith.cmpi eq, %26, %27 : vector<8x128xi32>
    %cst_14 = arith.constant 0.000000e+00 : f32
    %29 = vector.broadcast %cst_14 : f32 to vector<8x128xf32>
    %30 = arith.select %28, %3, %29 : vector<8x128xi1>, vector<8x128xf32>
    %cst_15 = arith.constant dense<0.000000e+00> : vector<8x128xf32>
    %31 = tpu.matmul %30, %14, %cst_15 {dimension_numbers = #tpu.dot_dimension_numbers<[1], [0], [0], [1], [0, 0, 1, 1], [], []>, precision = #tpu.contract_precision<fp32>} : vector<8x128xf32>, vector<128x128xf32>, vector<8x128xf32> -> vector<8x128xf32>
    %c0_16 = arith.constant 0 : index
    %c0_17 = arith.constant 0 : index
    %32 = vector.load %arg7[%c0_16, %c0_17] : memref<8x128xf32, #tpu.memory_space<vmem>>, vector<8x128xf32>
    %33 = arith.addf %32, %31 : vector<8x128xf32>
    %c0_18 = arith.constant 0 : index
    %c0_19 = arith.constant 0 : index
    %34 = vector.load %arg7[%c0_18, %c0_19] : memref<8x128xf32, #tpu.memory_space<vmem>>, vector<8x128xf32>
    tpu.vector_store %arg7[%c0_18, %c0_19], %33 {strides = array<i32>} : memref<8x128xf32, #tpu.memory_space<vmem>>, vector<8x128xf32>,
    %c0_i32_20 = arith.constant 0 : i32
    %35 = arith.cmpi eq, %arg1, %c0_i32_20 : i32
    %36 = arith.extui %35 : i1 to i32
    %c0_i32_21 = arith.constant 0 : i32
    %37 = arith.cmpi ne, %36, %c0_i32_21 : i32
    scf.if %37 {
      %c0_22 = arith.constant 0 : index
      %c0_23 = arith.constant 0 : index
      %38 = vector.load %arg6[%c0_22, %c0_23] : memref<8x128xf32, #tpu.memory_space<vmem>>, vector<8x1xf32>
      %39 = math.log %38 : vector<8x1xf32>
      %c0_24 = arith.constant 0 : index
      %c0_25 = arith.constant 0 : index
      %40 = vector.load %arg5[%c0_24, %c0_25] : memref<8x1xf32, #tpu.memory_space<vmem>>, vector<8x1xf32>
      %41 = arith.addf %39, %40 : vector<8x1xf32>
      %c0_26 = arith.constant 0 : index
      %c0_27 = arith.constant 0 : index
      %42 = vector.load %arg7[%c0_26, %c0_27] : memref<8x128xf32, #tpu.memory_space<vmem>>, vector<8x1xf32>
      %43 = arith.subf %41, %42 : vector<8x1xf32>
      %44 = vector.shape_cast %43 : vector<8x1xf32> to vector<1x8x1xf32>
      %cst_28 = arith.constant dense<0.000000e+00> : vector<1xf32>
      %45 = vector.multi_reduction <add>, %44, %cst_28 [1, 2] : vector<1x8x1xf32> to vector<1xf32>
      %46 = vector.shape_cast %45 : vector<1xf32> to vector<1x1x1xf32>
      %47 = vector.extract %46[0, 0, 0] : f32 from vector<1x1x1xf32>
      %48 = vector.broadcast %47 : f32 to vector<1x1x128xf32>
      %c0_29 = arith.constant 0 : index
      %c0_30 = arith.constant 0 : index
      %c0_31 = arith.constant 0 : index
      %49 = vector.load %arg4[%c0_29, %c0_30, %c0_31] : memref<1x1x128xf32, #tpu.memory_space<vmem>>, vector<1x1x128xf32>
      tpu.vector_store %arg4[%c0_29, %c0_30, %c0_31], %48 {strides = array<i32>} : memref<1x1x128xf32, #tpu.memory_space<vmem>>, vector<1x1x128xf32>,
    } else {
    }
    return
  }
  func.func @transform_0(%arg0: i32, %arg1: i32) -> (i32, i32) {
    %c0_i32 = arith.constant 0 : i32
    return %arg0, %arg1 : i32, i32
  }
  func.func @transform_1(%arg0: i32, %arg1: i32) -> (i32, i32) {
    %c0_i32 = arith.constant 0 : i32
    %c0_i32_0 = arith.constant 0 : i32
    return %arg0, %c0_i32 : i32, i32
  }
  func.func @transform_2(%arg0: i32, %arg1: i32) -> (i32, i32, i32) {
    %c0_i32 = arith.constant 0 : i32
    %c0_i32_0 = arith.constant 0 : i32
    %c0_i32_1 = arith.constant 0 : i32
    return %arg0, %c0_i32, %c0_i32_0 : i32, i32, i32
  }
}

</mosaic_0001>

<bundles_post_ra>
// kernel: tpu_custom_call.1
= control target key start
LH: loop header
LB: loop body
LE: loop exit
PB: predicated region body
PF: predicated region fallthrough
CT: control target
= control target key end

     0   :  { %s1644_s0 = inlined_call_operand.vmem [shape: f32[8,128], index: 0, kind: input, shape index: {}]   ;;  %s1645_s1 = inlined_call_operand.vmem [shape: s32[8,1], index: 1, kind: input, shape index: {}]   ;;  %s1646_s2 = inlined_call_operand.hbm [shape: f32[1,1,128], index: 2, kind: output, shape index: {}]  }
   0x1   :  { %v1489_v0 = vld [vmem:[%s1644_s0] sm:$0xff] }
   0x2   :  { %v21_v1 = vld [vmem:[%s1645_s1] sm:$0xff] }
   0x3   :  { %7 = vsyncpa [#allocation6], 0  ;;  %26 = vmax.xlane.f32.xlu0 %v1489_v0  ;;  %v1464_v2 = vmov 0   ;;  %vm16_vm0 = vcmask 7168   ;;  %v1465_v3 = vmov -inf   ;;  %v1466_v4 = vmov 0.0|0.0  }
   0x4   :  { %1433 = vset.pattern.permute.xlu1 %v1464_v2  ;;  %1432 = vset.pattern.permute.xlu0 %v1464_v2  ;;  %17 = vst.msk [vmem:[#allocation2] sm:$0xff] %vm16_vm0, %v1465_v3  ;;  %v1467_v5 = vmov 1.0|1.0   ;;  %vm1468_vm1 = vmmov 0   ;;  %v1469_v6 = vmov 0.0   ;;  %v22_v7 = vlaneseq  ;;  %s1470_s0 = smov [#allocation5]  }
   0x5   :  { %487 = vperm.xlu1 %1433, %v21_v1   ;;  %1365 = vmatprep.subr.bf16.mxu1 %v1466_v4  ;;  %s955_s1 = sshll.u32 %s1470_s0, 4  ;;  %s956_s1 = int_to_ptr.vmem [resolvable:$true] %s955_s1 }
   0x6   :  { %1317 = vmatprep.subr.bf16.mxu0 %v1466_v4  ;;  %1366 = vmatpush3.bf16.msra.mxu1 %v1467_v5  ;;  %v23_v8 = vand.u32 127, %v22_v7  ;;  %s1440_s14 = scalar_lea.vmem %s956_s1, 16  ;;  %s1444_s15 = scalar_lea.vmem %s956_s1, 32 }
   0x7   :  { %1229 = vmatprep.mubr.msk.f32.mxu1 %vm1468_vm1, %v1469_v6  ;;  %1367 = vmatprep.subr.bf16.mxu1 %v1466_v4  ;;  %p1441_p0 = scmp.ne.s32.totalorder %s956_s1, %s1440_s14  ;;  %p1445_p1 = scmp.lt.s32.totalorder %s956_s1, %s956_s1 }
   0x8   :  { %1318 = vmatpush3.bf16.msra.mxu0 %v1467_v5  ;;  %1109 = vmatprep.mubr.msk.f32.mxu0 %vm1468_vm1, %v1469_v6  ;;  %p1446_p2 = scmp.lt.s32.totalorder %s1444_s15, %s1440_s14 }
   0x9   :  { %1319 = vmatprep.subr.bf16.mxu0 %v1466_v4 }
   0xa   :  { %1368 = vmatpush3.bf16.msra.mxu1 %v1467_v5  ;;  %p1447_p3 = por %p1446_p2, %p1445_p1 }
   0xb   :  { %1369 = vmatprep.subr.bf16.mxu1 %v1466_v4  ;;  %v25_v15 = vld [vmem:[#allocation2] sm:$0xff] }
   0xc   :  { %1320 = vmatpush3.bf16.msra.mxu0 %v1467_v5  ;;  %p1448_p4 = pnand %p1447_p3, %p1441_p0 }
   0xd   :  { %1321 = vmatprep.subr.bf16.mxu0 %v1466_v4 }
   0xe   :  { %1370 = vmatpush3.bf16.msra.mxu1 %v1467_v5 }
   0xf   :  { %1371 = vmatprep.subr.bf16.mxu1 %v1466_v4 }
  0x10   :  { %1322 = vmatpush3.bf16.msra.mxu0 %v1467_v5 }
  0x11   :  { %1323 = vmatprep.subr.bf16.mxu0 %v1466_v4 }
  0x12   :  { %1372 = vmatpush3.bf16.msra.mxu1 %v1467_v5 }
  0x13   :  { %1373 = vmatprep.subr.bf16.mxu1 %v1466_v4 }
  0x14   :  { %1324 = vmatpush3.bf16.msra.mxu0 %v1467_v5 }
  0x15   :  { %1325 = vmatprep.subr.bf16.mxu0 %v1466_v4 }
  0x16   :  { %1374 = vmatpush3.bf16.msra.mxu1 %v1467_v5 }
  0x17   :  { %1375 = vmatprep.subr.bf16.mxu1 %v1466_v4 }
  0x18   :  { %1326 = vmatpush3.bf16.msra.mxu0 %v1467_v5 }
  0x19   :  { %1327 = vmatprep.subr.bf16.mxu0 %v1466_v4 }
  0x1a   :  { %1376 = vmatpush3.bf16.msra.mxu1 %v1467_v5 }
  0x1b   :  { %1377 = vmatprep.subr.bf16.mxu1 %v1466_v4 }
  0x1c   :  { %1328 = vmatpush3.bf16.msra.mxu0 %v1467_v5 }
  0x1d   :  { %1329 = vmatprep.subr.bf16.mxu0 %v1466_v4 }
  0x1e   :  { %1378 = vmatpush3.bf16.msra.mxu1 %v1467_v5 }
  0x1f   :  { %1379 = vmatprep.subr.bf16.mxu1 %v1466_v4 }
  0x20   :  { %1330 = vmatpush3.bf16.msra.mxu0 %v1467_v5 }
  0x21   :  { %1331 = vmatprep.subr.bf16.mxu0 %v1466_v4 }
  0x22   :  { %1380 = vmatpush3.bf16.msra.mxu1 %v1467_v5 }
  0x23   :  { %1232 = vmatprep.subr.mxu1 %v1469_v6 }
  0x24   :  { %1332 = vmatpush3.bf16.msra.mxu0 %v1467_v5 }
  0x25   :  { %1112 = vmatprep.subr.mxu0 %v1469_v6 }
  0x84   :  { %v488_v9 = vpop.permute.xlu1 %487 }
  0x85   :  { %vm489_vm2 = vcmp.eq.s32.totalorder %v23_v8, %v488_v9 }
  0x86   :  { %v490_v10 = vsel %vm489_vm2, %v1489_v0, 0.0 }
  0x87   :  { %v556_v11 = vand.u32 4294901760, %v490_v10 }
  0x89   :  { %v557_v12 = vsub.f32 %v490_v10, %v556_v11 }
  0x8b   :  { %v558_v13 = vand.u32 4294901760, %v557_v12 }
  0x8d   :  { %v559_v14 = vsub.f32 %v557_v12, %v558_v13 }
  0x8f   :  { %v560_v16 = vand.u32 4294901760, %v559_v14 }
  0x90   :  { %v27_v17 = vpop.xlane.xlu0 %26 }
  0x91   :  { %1230 = vmatmul.mubr.f32.vlgmr.msra.gmra.mrb[0].mxu1 %v560_v16  ;;  %v28_v18 = vmax.f32 %v25_v15, %v27_v17 }
  0x92   :  { %1233 = vmatpush3.msra.mxu1 %v1469_v6  ;;  %1234 = vmatprep.mubr.msk.f32.mxu1 %vm1468_vm1, %v1469_v6 }
  0x93   :  { %1237 = vmatprep.subr.mxu1 %v1469_v6  ;;  %v470_v19 = vsub.f32 %v25_v15, %v28_v18  ;;  %483 = vst.msk [vmem:[#allocation2] sm:$0xff] %vm16_vm0, %v28_v18  ;;  %31 = vperm.xlu0 %1432, %v28_v18  }
  0x95   :  { %v471_v20 = vmul.f32 1.442695, %v470_v19 }
  0x97   :  { %1434 = vpow2.f32 %v471_v20 }
  0x99   :  { %1235 = vmatmul.mubr.f32.vlgmr.msra.gmra.mrb[0].mxu1 %v556_v11 }
  0x9a   :  { %1238 = vmatpush3.msra.mxu1 %v1469_v6  ;;  %1239 = vmatprep.mubr.msk.f32.mxu1 %vm1468_vm1, %v1469_v6  ;;  %v933_v55 = vld [vmem:[#allocation2] sm:$0xff] }
  0x9b   :  { %1381 = vmatprep.subr.bf16.mxu1 %v1466_v4 }
  0xa1   :  { %1240 = vmatmul.mubr.f32.vlgmr.msra.gmra.mrb[0].mxu1 %v557_v12  ;;  %v1435_v21 = vpop.eup %1434 }
  0xa2   :  { %1382 = vmatpush3.bf16.msra.mxu1 %v1467_v5  ;;  %1274 = vmatprep.mubr.msk.f32.mxu1 %vm1468_vm1, %v1469_v6 }
  0xa3   :  { %476 = vperm.xlu1 %1433, %v1435_v21   ;;  %1383 = vmatprep.subr.bf16.mxu1 %v1466_v4 }
  0xa6   :  { %1384 = vmatpush3.bf16.msra.mxu1 %v1467_v5 }
  0xa7   :  { %1385 = vmatprep.subr.bf16.mxu1 %v1466_v4 }
  0xaa   :  { %1386 = vmatpush3.bf16.msra.mxu1 %v1467_v5 }
  0xab   :  { %1387 = vmatprep.subr.bf16.mxu1 %v1466_v4 }
  0xae   :  { %1388 = vmatpush3.bf16.msra.mxu1 %v1467_v5 }
  0xaf   :  { %1389 = vmatprep.subr.bf16.mxu1 %v1466_v4 }
  0xb2   :  { %1390 = vmatpush3.bf16.msra.mxu1 %v1467_v5 }
  0xb3   :  { %1391 = vmatprep.subr.bf16.mxu1 %v1466_v4 }
  0xb6   :  { %1392 = vmatpush3.bf16.msra.mxu1 %v1467_v5 }
  0xb7   :  { %1393 = vmatprep.subr.bf16.mxu1 %v1466_v4 }
  0xba   :  { %1394 = vmatpush3.bf16.msra.mxu1 %v1467_v5 }
  0xbb   :  { %1395 = vmatprep.subr.bf16.mxu1 %v1466_v4 }
  0xbe   :  { %1396 = vmatpush3.bf16.msra.mxu1 %v1467_v5 }
  0xbf   :  { %1277 = vmatprep.subr.mxu1 %v1469_v6 }
  0xc1   :  { %1275 = vmatmul.mubr.f32.vlgmr.msra.gmra.mrb[0].mxu1 %v558_v13 }
  0xc2   :  { %1278 = vmatpush3.msra.mxu1 %v1469_v6  ;;  %1279 = vmatprep.mubr.msk.f32.mxu1 %vm1468_vm1, %v1469_v6 }
  0xc3   :  { %1397 = vmatprep.subr.bf16.mxu1 %v1466_v4 }
  0xc9   :  { %1280 = vmatmul.mubr.f32.vlgmr.msra.gmra.mrb[0].mxu1 %v556_v11 }
  0xca   :  { %1398 = vmatpush3.bf16.msra.mxu1 %v1467_v5  ;;  %1314 = vmatprep.mubr.msk.f32.mxu1 %vm1468_vm1, %v1469_v6 }
  0xcb   :  { %1399 = vmatprep.subr.bf16.mxu1 %v1466_v4 }
  0xce   :  { %1400 = vmatpush3.bf16.msra.mxu1 %v1467_v5 }
  0xcf   :  { %1401 = vmatprep.subr.bf16.mxu1 %v1466_v4 }
  0xd2   :  { %1402 = vmatpush3.bf16.msra.mxu1 %v1467_v5 }
  0xd3   :  { %1403 = vmatprep.subr.bf16.mxu1 %v1466_v4 }
  0xd6   :  { %1404 = vmatpush3.bf16.msra.mxu1 %v1467_v5 }
  0xd7   :  { %1405 = vmatprep.subr.bf16.mxu1 %v1466_v4 }
  0xda   :  { %1406 = vmatpush3.bf16.msra.mxu1 %v1467_v5 }
  0xdb   :  { %1407 = vmatprep.subr.bf16.mxu1 %v1466_v4 }
  0xde   :  { %1408 = vmatpush3.bf16.msra.mxu1 %v1467_v5 }
  0xdf   :  { %1409 = vmatprep.subr.bf16.mxu1 %v1466_v4 }
  0xe2   :  { %1410 = vmatpush3.bf16.msra.mxu1 %v1467_v5 }
  0xe3   :  { %1411 = vmatprep.subr.bf16.mxu1 %v1466_v4 }
  0xe6   :  { %1412 = vmatpush3.bf16.msra.mxu1 %v1467_v5 }
  0xe9   :  { %1315 = vmatmul.mubr.f32.vlgmr.msra.gmra.mrb[0].mxu1 %v556_v11 }
 0x112   :  { %v32_v22 = vpop.permute.xlu0 %31 }
 0x113   :  { %v34_v23 = vsub.f32 %v1489_v0, %v32_v22 }
 0x115   :  { %v35_v24 = vmul.f32 1.442695, %v34_v23 }
 0x117   :  { %1436 = vpow2.f32 %v35_v24 }
 0x121   :  { %v1437_v25 = vpop.eup %1436 }
 0x122   :  { %v102_v26 = vand.u32 4294901760, %v1437_v25  ;;  %v477_v47 = vpop.permute.xlu1 %476 }
 0x123   :  { %v479_v49 = vmul.f32 0.0, %v477_v47 }
 0x124   :  { %v103_v27 = vsub.f32 %v1437_v25, %v102_v26 }
 0x126   :  { %v104_v28 = vand.u32 4294901760, %v103_v27 }
 0x128   :  { %v105_v29 = vsub.f32 %v103_v27, %v104_v28 }
 0x12a   :  { %v106_v30 = vand.u32 4294901760, %v105_v29 }
 0x12c   :  { %1110 = vmatmul.mubr.f32.vlgmr.msra.gmra.mrb[0].mxu0 %v106_v30 }
 0x12d   :  { %1113 = vmatpush3.msra.mxu0 %v1469_v6  ;;  %1114 = vmatprep.mubr.msk.f32.mxu0 %vm1468_vm1, %v1469_v6 }
 0x12e   :  { %1117 = vmatprep.subr.mxu0 %v1469_v6 }
 0x130   :  { %1115 = vmatmul.mubr.f32.vlgmr.msra.gmra.mrb[2].mxu0 %v102_v26 }
 0x131   :  { %1118 = vmatpush3.msra.mxu0 %v1469_v6  ;;  %1119 = vmatprep.mubr.msk.f32.mxu0 %vm1468_vm1, %v1469_v6 }
 0x132   :  { %1333 = vmatprep.subr.bf16.mxu0 %v1466_v4 }
 0x134   :  { %1120 = vmatmul.mubr.f32.vlgmr.msra.gmra.mrb[4].mxu0 %v103_v27 }
 0x135   :  { %1334 = vmatpush3.bf16.msra.mxu0 %v1467_v5  ;;  %1154 = vmatprep.mubr.msk.f32.mxu0 %vm1468_vm1, %v1469_v6 }
 0x136   :  { %1335 = vmatprep.subr.bf16.mxu0 %v1466_v4 }
 0x139   :  { %1336 = vmatpush3.bf16.msra.mxu0 %v1467_v5 }
 0x13a   :  { %1337 = vmatprep.subr.bf16.mxu0 %v1466_v4 }
 0x13d   :  { %1338 = vmatpush3.bf16.msra.mxu0 %v1467_v5 }
 0x13e   :  { %1339 = vmatprep.subr.bf16.mxu0 %v1466_v4 }
 0x141   :  { %1340 = vmatpush3.bf16.msra.mxu0 %v1467_v5 }
 0x142   :  { %1341 = vmatprep.subr.bf16.mxu0 %v1466_v4 }
 0x145   :  { %1342 = vmatpush3.bf16.msra.mxu0 %v1467_v5 }
 0x146   :  { %1343 = vmatprep.subr.bf16.mxu0 %v1466_v4 }
 0x149   :  { %1344 = vmatpush3.bf16.msra.mxu0 %v1467_v5 }
 0x14a   :  { %1345 = vmatprep.subr.bf16.mxu0 %v1466_v4 }
 0x14d   :  { %1346 = vmatpush3.bf16.msra.mxu0 %v1467_v5 }
 0x14e   :  { %1347 = vmatprep.subr.bf16.mxu0 %v1466_v4 }
 0x151   :  { %1348 = vmatpush3.bf16.msra.mxu0 %v1467_v5 }
 0x152   :  { %1157 = vmatprep.subr.mxu0 %v1469_v6 }
 0x154   :  { %1155 = vmatmul.mubr.f32.vlgmr.msra.gmra.mrb[6].mxu0 %v104_v28 }
 0x155   :  { %1158 = vmatpush3.msra.mxu0 %v1469_v6  ;;  %1159 = vmatprep.mubr.msk.f32.mxu0 %vm1468_vm1, %v1469_v6 }
 0x156   :  { %1349 = vmatprep.subr.bf16.mxu0 %v1466_v4 }
 0x158   :  { %1160 = vmatmul.mubr.f32.vlgmr.msra.gmra.mrb[8].mxu0 %v102_v26 }
 0x159   :  { %1350 = vmatpush3.bf16.msra.mxu0 %v1467_v5  ;;  %1194 = vmatprep.mubr.msk.f32.mxu0 %vm1468_vm1, %v1469_v6 }
 0x15a   :  { %1351 = vmatprep.subr.bf16.mxu0 %v1466_v4 }
 0x15d   :  { %1352 = vmatpush3.bf16.msra.mxu0 %v1467_v5 }
 0x15e   :  { %1353 = vmatprep.subr.bf16.mxu0 %v1466_v4 }
 0x161   :  { %1354 = vmatpush3.bf16.msra.mxu0 %v1467_v5 }
 0x162   :  { %1355 = vmatprep.subr.bf16.mxu0 %v1466_v4 }
 0x165   :  { %1356 = vmatpush3.bf16.msra.mxu0 %v1467_v5 }
 0x166   :  { %1357 = vmatprep.subr.bf16.mxu0 %v1466_v4 }
 0x169   :  { %1358 = vmatpush3.bf16.msra.mxu0 %v1467_v5 }
 0x16a   :  { %1359 = vmatprep.subr.bf16.mxu0 %v1466_v4 }
 0x16d   :  { %1360 = vmatpush3.bf16.msra.mxu0 %v1467_v5 }
 0x16e   :  { %1361 = vmatprep.subr.bf16.mxu0 %v1466_v4 }
 0x171   :  { %1362 = vmatpush3.bf16.msra.mxu0 %v1467_v5 }
 0x172   :  { %1363 = vmatprep.subr.bf16.mxu0 %v1466_v4 }
 0x175   :  { %1364 = vmatpush3.bf16.msra.mxu0 %v1467_v5 }
 0x178   :  { %1195 = vmatmul.mubr.f32.vlgmr.msra.gmra.mrb[10].mxu0 %v102_v26 }
 0x1bc   :  { %v920_v31 = vpop.f32.mrb[0].mxu1 }
 0x1bd   :  { %v1316_v32 = vpop.f32.mrb[1].mxu1 }
 0x1ff   :  { %v108_v33 = vpop.f32.mrb[0].mxu0 }
 0x200   :  { %v1111_v34 = vpop.f32.mrb[1].mxu0 }
 0x203   :  { %v179_v35 = vpop.f32.mrb[2].mxu0 }
 0x204   :  { %v180_v36 = vadd.f32 %v179_v35, %v108_v33  ;;  %v1116_v37 = vpop.f32.mrb[3].mxu0 }
 0x207   :  { %v251_v38 = vpop.f32.mrb[4].mxu0 }
 0x208   :  { %v252_v39 = vadd.f32 %v251_v38, %v180_v36  ;;  %v1121_v40 = vpop.f32.mrb[5].mxu0 }
 0x227   :  { %v324_v41 = vpop.f32.mrb[6].mxu0 }
 0x228   :  { %v325_v42 = vadd.f32 %v324_v41, %v252_v39  ;;  %v1156_v43 = vpop.f32.mrb[7].mxu0 }
 0x22b   :  { %v395_v44 = vpop.f32.mrb[8].mxu0 }
 0x22c   :  { %v396_v45 = vadd.f32 %v395_v44, %v325_v42  ;;  %v1161_v46 = vpop.f32.mrb[9].mxu0 }
 0x24b   :  { %v466_v48 = vpop.f32.mrb[10].mxu0 }
 0x24c   :  { %v467_v50 = vadd.f32 %v466_v48, %v396_v45  ;;  %v1196_v51 = vpop.f32.mrb[11].mxu0 }
 0x24e   :  { %v480_v52 = vadd.f32 %v479_v49, %v467_v50 }
 0x250   :  { %1438 = vlog2.f32 %v480_v52 }
 0x25a   :  { %v1439_v53 = vpop.eup %1438 }
 0x25b   :  { %v932_v54 = vmul.f32 0.6931472, %v1439_v53 }
 0x25d   :  { %v934_v56 = vadd.f32 %v933_v55, %v932_v54 }
 0x25f   :  { %v936_v57 = vsub.f32 %v934_v56, %v920_v31 }
 0x261   :  { %v937_v58 = vsel %vm16_vm0, %v936_v57, 0.0 }
 0x262   :  { %938 = vadd.xlane.f32.xlu1 %v937_v58 }
 0x2ef   :  { %v939_v59 = vpop.xlane.xlu1 %938 }
 0x2f0   :  { %v940_v60 = vrot.slane %v939_v59, 4 }
 0x2f2   :  { %v941_v61 = vadd.f32 %v940_v60, %v939_v59 }
 0x2f4   :  { %v942_v62 = vrot.slane %v941_v61, 2 }
 0x2f6   :  { %v943_v63 = vadd.f32 %v942_v62, %v941_v61 }
 0x2f8   :  { %v944_v0 = vrot.slane %v943_v63, 1 }
 0x2fa   :  { %v945_v1 = vadd.f32 %v944_v0, %v943_v63 }
 0x2fc   :  { %1423 = vpush %v945_v1 }
 0x32d   :  { %s1424_s13 = spop %1423 }
 0x32e   :  { %v947_v2 = vstv %s1424_s13 }
 0x32f   :  { %948 = vst [vmem:[#allocation5] sm:$0x1] %v947_v2 }
 0x330   :  { %1451 = shalt.err (!%p1448_p4)
}
 0x331   :  { %s1452_s18 = scalar_lea.hbm %s1646_s2, 16 }
 0x332   :  { %p1453_p5 = scmp.ne.s32.totalorder %s1646_s2, %s1452_s18  ;;  %p1456_p6 = scmp.lt.u32.totalorder %s1452_s18, %s1646_s2 }
 0x334   :  { %p1458_p7 = pnand %p1456_p6, %p1453_p5 }
 0x336   :  { %1461 = shalt.err (!%p1458_p7)
}
 0x337   :  { %958 = dma.vmem_to_hbm [thread:$0]  %s956_s1, 16, %s1646_s2, [#allocation6]  }
 0x338   :  { %1462 = dma.done.wait [#allocation6], 16  }
 0x339   :  { %1463 = vsyncadd [#allocation6], 4294967280 }
 0x33a   :  { %962 = vsyncpa [#allocation6], 1 }

</bundles_post_ra>
